<compile_context>
chip_gen: v7x
topology: tpu7x:2x2x1
jax: 0.10.0
libtpu: 0.0.40
codegen_flags: <defaults>
</compile_context>

<pallas_src>
import functools

import jax
import jax.numpy as jnp
from jax.experimental import pallas as pl
from jax.experimental.pallas import tpu as pltpu

N_PAD = 128   # lane-padded fused output-channel dim (= padded sum(num_channels))
V_PAD = 128   # lane-padded vocab dim for the in-kernel one-hot gather


def textcnn_kernel(tok_ref, table_ref, wf_ref, bf_ref, mask_ref, wd_ref, bd_ref,
                   out_ref):
    tb, seq = tok_ref.shape
    vpad, cin = table_ref.shape
    kmax = wf_ref.shape[0] // cin
    npad = wf_ref.shape[1]
    m = tb * seq

    # 1) Fused embedding lookup: one-hot(tokens) @ [emb ; const_emb] on the MXU.
    #    (Exact for tokens < V_PAD; for large vocabularies this should become a
    #     scalar-prefetch / DMA row gather instead.)
    # TODO(synk): large-vocab embedding gather via PrefetchScalarGridSpec + DMA.
    tok = tok_ref[...]                                            # (tb, L) int32
    onehot = (tok[:, :, None] ==
              jax.lax.broadcasted_iota(jnp.int32, (tb, seq, vpad), 2)
              ).astype(jnp.bfloat16).reshape(m, vpad)             # (M, V_PAD)
    x = jnp.dot(onehot, table_ref[...],
                preferred_element_type=jnp.float32)               # (M, Cin)
    x = x.astype(jnp.bfloat16)                                    # rows = (b, pos)

    # 2) im2col: build the k_max shifted copies ONCE (values stay in vregs).
    #    Circular wrap rows only ever land on positions that the validity mask
    #    zeroes out (or hit zero weight rows), so no padding is needed.
    taps = [x if dk == 0 else jnp.roll(x, -dk, axis=0) for dk in range(kmax)]
    im2col = jnp.concatenate(taps, axis=1)                        # (M, kmax*Cin)

    # 3) Single fused conv matmul for all branches & taps, lane-dense N=128.
    conv = jnp.dot(im2col, wf_ref[...],
                   preferred_element_type=jnp.float32)            # (M, N_PAD)
    conv = conv + bf_ref[...]                                     # fused bias
    act = jnp.maximum(conv, 0.0).reshape(tb, seq, npad)           # ReLU

    # 4) Mask per-branch invalid sequence positions, then global max pool.
    act = act * mask_ref[...][None, :, :]
    enc = jnp.max(act, axis=1)                                    # (tb, N_PAD)

    # 5) Decoder.  Dropout(p=0.5) is identity in eval mode.
    # TODO(synk): training-mode dropout (stateful PRNG mask) not implemented.
    out = jnp.dot(enc.astype(jnp.bfloat16), wd_ref[...],
                  preferred_element_type=jnp.float32) + bd_ref[...]
    out_ref[...] = out.astype(out_ref.dtype)


def textcnn_forward(tokens, emb, const_emb, conv_ws, conv_bs, wd, bd, *,
                    tile_b=8):
    """tokens: (B, L) int32.  Params mirror the PyTorch module:
       emb/const_emb: (V, E); conv_ws[i]: (k_i, 2E, c_i)  (PyTorch Conv1d weight
       (c_i, 2E, k_i) transposed); conv_bs[i]: (c_i,); wd: (sum(c), 2) (= W.T);
       bd: (2,)."""
    assert tile_b % 8 == 0, "tile_b must be a multiple of 8 (sublane tiling)"
    B, L = tokens.shape
    V, E = emb.shape
    cin = 2 * E
    kernel_sizes = [int(w.shape[0]) for w in conv_ws]
    kmax = max(kernel_sizes)
    nclass = wd.shape[1]
    assert V <= V_PAD and sum(w.shape[-1] for w in conv_ws) <= N_PAD

    # ---- fused, lane-padded parameters (built once; bf16 MXU inputs) ----
    table = (jnp.zeros((V_PAD, cin), jnp.float32)
             .at[:V].set(jnp.concatenate([emb, const_emb], axis=1))
             .astype(jnp.bfloat16))                                # (V_PAD, Cin)

    wf = jnp.zeros((kmax * cin, N_PAD), jnp.float32)
    bf = jnp.zeros((1, N_PAD), jnp.float32)
    mask = jnp.zeros((L, N_PAD), jnp.float32)
    off = 0
    for w, b, k in zip(conv_ws, conv_bs, kernel_sizes):
        c = w.shape[-1]
        for dk in range(k):
            wf = wf.at[dk * cin:(dk + 1) * cin, off:off + c].set(w[dk])
        bf = bf.at[0, off:off + c].set(b)
        mask = mask.at[:L - k + 1, off:off + c].set(1.0)           # valid positions
        off += c
    wf = wf.astype(jnp.bfloat16)

    wd_pad = (jnp.zeros((N_PAD, N_PAD), jnp.float32)
              .at[:off, :nclass].set(wd).astype(jnp.bfloat16))
    bd_pad = jnp.zeros((1, N_PAD), jnp.float32).at[0, :nclass].set(bd)

    # ---- batch tiling (pad B to a multiple of tile_b; extra rows dropped) ----
    b_pad = pl.cdiv(B, tile_b) * tile_b
    if b_pad != B:
        tokens = jnp.concatenate(
            [tokens, jnp.zeros((b_pad - B, L), tokens.dtype)], axis=0)

    grid = (b_pad // tile_b,)
    full2d = lambda shape: pl.BlockSpec(shape, lambda i: (0, 0))

    out = pl.pallas_call(
        textcnn_kernel,
        out_shape=jax.ShapeDtypeStruct((b_pad, N_PAD), jnp.float32),
        grid=grid,
        in_specs=[
            pl.BlockSpec((tile_b, L), lambda i: (i, 0)),           # tokens
            full2d(table.shape),                                   # emb table
            full2d(wf.shape), full2d(bf.shape),                    # fused conv
            full2d(mask.shape),                                    # validity mask
            full2d(wd_pad.shape), full2d(bd_pad.shape),            # decoder
        ],
        out_specs=pl.BlockSpec((tile_b, N_PAD), lambda i: (i, 0)),
        compiler_params=pltpu.CompilerParams(
            dimension_semantics=("parallel",),                     # megacore
            vmem_limit_bytes=32 * 1024 * 1024),
    )(tokens, table, wf, bf, mask, wd_pad, bd_pad)
    return out[:B, :nclass]


def textcnn_reference(tokens, emb, const_emb, conv_ws, conv_bs, wd, bd):
    """Plain-JAX reference (bf16 parameters, f32 math) matching the module."""
    bf16 = lambda a: a.astype(jnp.bfloat16).astype(jnp.float32)
    x = jnp.concatenate([bf16(emb)[tokens], bf16(const_emb)[tokens]], axis=-1)
    encs = []
    for w, b in zip(conv_ws, conv_bs):
        k = w.shape[0]
        lout = x.shape[1] - k + 1
        conv = sum(
            jnp.einsum('blc,co->blo', x[:, dk:dk + lout, :], bf16(w)[dk],
                       precision=jax.lax.Precision.HIGHEST)
            for dk in range(k)) + b[None, None, :]
        encs.append(jnp.max(jax.nn.relu(conv), axis=1))
    enc = bf16(jnp.concatenate(encs, axis=1))
    return jnp.dot(enc, bf16(wd), precision=jax.lax.Precision.HIGHEST) + bd[None, :]


if __name__ == "__main__":
    key = jax.random.PRNGKey(0)
    vocab_size, embed_size = 50, 8
    kernel_sizes = (3, 4, 5)
    num_channels = (4, 4, 8)
    B, L = 16, 16
    cin = 2 * embed_size

    keys = jax.random.split(key, 12)
    emb = 0.1 * jax.random.normal(keys[0], (vocab_size, embed_size), jnp.float32)
    const_emb = 0.1 * jax.random.normal(keys[1], (vocab_size, embed_size), jnp.float32)

    conv_ws, conv_bs = [], []
    for i, (c, k) in enumerate(zip(num_channels, kernel_sizes)):
        conv_ws.append(0.1 * jax.random.normal(keys[2 + 2 * i], (k, cin, c), jnp.float32))
        conv_bs.append(0.1 * jax.random.normal(keys[3 + 2 * i], (c,), jnp.float32))
    wd = 0.1 * jax.random.normal(keys[8], (sum(num_channels), 2), jnp.float32)
    bd = 0.1 * jax.random.normal(keys[9], (2,), jnp.float32)

    tokens = jax.random.randint(keys[10], (B, L), 0, vocab_size, dtype=jnp.int32)

    out = textcnn_forward(tokens, emb, const_emb, conv_ws, conv_bs, wd, bd,
                          tile_b=8)
    out = jax.block_until_ready(out)

    ref = textcnn_reference(tokens, emb, const_emb, conv_ws, conv_bs, wd, bd)
    assert out.shape == (B, 2) and out.dtype == jnp.float32
    assert jnp.allclose(out, ref, atol=1e-2, rtol=1e-2), (
        f"max abs err {jnp.max(jnp.abs(out - ref))}")
    print("KERNEL_OK")
</pallas_src>

<mosaic_0001>
module attributes {stable_mosaic.version = 11 : i64} {
  func.func @textcnn_kernel(%arg0: i32, %arg1: memref<8x16xi32, #tpu.memory_space<vmem>>, %arg2: memref<128x16xbf16, #tpu.memory_space<vmem>>, %arg3: memref<80x128xbf16, #tpu.memory_space<vmem>>, %arg4: memref<1x128xf32, #tpu.memory_space<vmem>>, %arg5: memref<16x128xf32, #tpu.memory_space<vmem>>, %arg6: memref<128x128xbf16, #tpu.memory_space<vmem>>, %arg7: memref<1x128xf32, #tpu.memory_space<vmem>>, %arg8: memref<8x128xf32, #tpu.memory_space<vmem>>) attributes {dimension_semantics = [#tpu.dimension_semantics<parallel>], iteration_bounds = array<i64: 2>, scalar_prefetch = 0 : i64, scratch_operands = 0 : i64, tpu.core_type = #tpu.core_type<tc>, window_params = [{transform_indices = @transform_0, window_bounds = array<i64: 8, 16>}, {pipeline_mode = #tpu.pipeline_mode<synchronous>, transform_indices = @transform_1, window_bounds = array<i64: 128, 16>}, {pipeline_mode = #tpu.pipeline_mode<synchronous>, transform_indices = @transform_2, window_bounds = array<i64: 80, 128>}, {pipeline_mode = #tpu.pipeline_mode<synchronous>, transform_indices = @transform_3, window_bounds = array<i64: 1, 128>}, {pipeline_mode = #tpu.pipeline_mode<synchronous>, transform_indices = @transform_4, window_bounds = array<i64: 16, 128>}, {pipeline_mode = #tpu.pipeline_mode<synchronous>, transform_indices = @transform_5, window_bounds = array<i64: 128, 128>}, {pipeline_mode = #tpu.pipeline_mode<synchronous>, transform_indices = @transform_6, window_bounds = array<i64: 1, 128>}, {transform_indices = @transform_7, window_bounds = array<i64: 8, 128>}]} {
    %c0 = arith.constant 0 : index
    %c0_0 = arith.constant 0 : index
    %0 = vector.load %arg1[%c0, %c0_0] : memref<8x16xi32, #tpu.memory_space<vmem>>, vector<8x16xi32>
    %1 = vector.shape_cast %0 : vector<8x16xi32> to vector<8x16x1xi32>
    %2 = tpu.iota {dimensions = array<i32: 2>} : vector<8x16x128xi32>
    %3 = vector.broadcast %1 : vector<8x16x1xi32> to vector<8x16x128xi32>
    %4 = arith.cmpi eq, %3, %2 : vector<8x16x128xi32>
    %5 = arith.extui %4 : vector<8x16x128xi1> to vector<8x16x128xi32>
    %6 = arith.sitofp %5 : vector<8x16x128xi32> to vector<8x16x128xf32>
    %7 = arith.truncf %6 : vector<8x16x128xf32> to vector<8x16x128xbf16>
    %8 = vector.shape_cast %7 : vector<8x16x128xbf16> to vector<128x128xbf16>
    %c0_1 = arith.constant 0 : index
    %c0_2 = arith.constant 0 : index
    %9 = vector.load %arg2[%c0_1, %c0_2] : memref<128x16xbf16, #tpu.memory_space<vmem>>, vector<128x16xbf16>
    %cst = arith.constant dense<0.000000e+00> : vector<128x16xf32>
    %10 = tpu.matmul %8, %9, %cst {dimension_numbers = #tpu.dot_dimension_numbers<[1], [0], [0], [1], [0, 0, 1, 1], [], []>} : vector<128x128xbf16>, vector<128x16xbf16>, vector<128x16xf32> -> vector<128x16xf32>
    %11 = arith.truncf %10 : vector<128x16xf32> to vector<128x16xbf16>
    %12 = vector.extract_strided_slice %11 {offsets = [1, 0], sizes = [127, 16], strides = [1, 1]} : vector<128x16xbf16> to vector<127x16xbf16>
    %13 = vector.extract_strided_slice %11 {offsets = [0, 0], sizes = [1, 16], strides = [1, 1]} : vector<128x16xbf16> to vector<1x16xbf16>
    %14 = tpu.concatenate %12, %13 in 0 : vector<127x16xbf16>, vector<1x16xbf16> -> vector<128x16xbf16>
    %15 = vector.extract_strided_slice %11 {offsets = [2, 0], sizes = [126, 16], strides = [1, 1]} : vector<128x16xbf16> to vector<126x16xbf16>
    %16 = vector.extract_strided_slice %11 {offsets = [0, 0], sizes = [2, 16], strides = [1, 1]} : vector<128x16xbf16> to vector<2x16xbf16>
    %17 = tpu.concatenate %15, %16 in 0 : vector<126x16xbf16>, vector<2x16xbf16> -> vector<128x16xbf16>
    %18 = vector.extract_strided_slice %11 {offsets = [3, 0], sizes = [125, 16], strides = [1, 1]} : vector<128x16xbf16> to vector<125x16xbf16>
    %19 = vector.extract_strided_slice %11 {offsets = [0, 0], sizes = [3, 16], strides = [1, 1]} : vector<128x16xbf16> to vector<3x16xbf16>
    %20 = tpu.concatenate %18, %19 in 0 : vector<125x16xbf16>, vector<3x16xbf16> -> vector<128x16xbf16>
    %21 = vector.extract_strided_slice %11 {offsets = [4, 0], sizes = [124, 16], strides = [1, 1]} : vector<128x16xbf16> to vector<124x16xbf16>
    %22 = vector.extract_strided_slice %11 {offsets = [0, 0], sizes = [4, 16], strides = [1, 1]} : vector<128x16xbf16> to vector<4x16xbf16>
    %23 = tpu.concatenate %21, %22 in 0 : vector<124x16xbf16>, vector<4x16xbf16> -> vector<128x16xbf16>
    %24 = tpu.concatenate %11, %14, %17, %20, %23 in 1 : vector<128x16xbf16>, vector<128x16xbf16>, vector<128x16xbf16>, vector<128x16xbf16>, vector<128x16xbf16> -> vector<128x80xbf16>
    %c0_3 = arith.constant 0 : index
    %c0_4 = arith.constant 0 : index
    %25 = vector.load %arg3[%c0_3, %c0_4] : memref<80x128xbf16, #tpu.memory_space<vmem>>, vector<80x128xbf16>
    %cst_5 = arith.constant dense<0.000000e+00> : vector<128x128xf32>
    %26 = tpu.matmul %24, %25, %cst_5 {dimension_numbers = #tpu.dot_dimension_numbers<[1], [0], [0], [1], [0, 0, 1, 1], [], []>} : vector<128x80xbf16>, vector<80x128xbf16>, vector<128x128xf32> -> vector<128x128xf32>
    %c0_6 = arith.constant 0 : index
    %c0_7 = arith.constant 0 : index
    %27 = vector.load %arg4[%c0_6, %c0_7] : memref<1x128xf32, #tpu.memory_space<vmem>>, vector<1x128xf32>
    %28 = vector.broadcast %27 : vector<1x128xf32> to vector<128x128xf32>
    %29 = arith.addf %26, %28 : vector<128x128xf32>
    %cst_8 = arith.constant 0.000000e+00 : f32
    %30 = vector.broadcast %cst_8 : f32 to vector<128x128xf32>
    %31 = arith.maximumf %29, %30 : vector<128x128xf32>
    %32 = vector.shape_cast %31 : vector<128x128xf32> to vector<8x16x128xf32>
    %c0_9 = arith.constant 0 : index
    %c0_10 = arith.constant 0 : index
    %33 = vector.load %arg5[%c0_9, %c0_10] : memref<16x128xf32, #tpu.memory_space<vmem>>, vector<16x128xf32>
    %34 = vector.shape_cast %33 : vector<16x128xf32> to vector<1x16x128xf32>
    %35 = vector.broadcast %34 : vector<1x16x128xf32> to vector<8x16x128xf32>
    %36 = arith.mulf %32, %35 : vector<8x16x128xf32>
    %cst_11 = arith.constant dense<0xFF800000> : vector<8x128xf32>
    %37 = vector.multi_reduction <maximumf>, %36, %cst_11 [1] : vector<8x16x128xf32> to vector<8x128xf32>
    %38 = arith.truncf %37 : vector<8x128xf32> to vector<8x128xbf16>
    %c0_12 = arith.constant 0 : index
    %c0_13 = arith.constant 0 : index
    %39 = vector.load %arg6[%c0_12, %c0_13] : memref<128x128xbf16, #tpu.memory_space<vmem>>, vector<128x128xbf16>
    %cst_14 = arith.constant dense<0.000000e+00> : vector<8x128xf32>
    %40 = tpu.matmul %38, %39, %cst_14 {dimension_numbers = #tpu.dot_dimension_numbers<[1], [0], [0], [1], [0, 0, 1, 1], [], []>} : vector<8x128xbf16>, vector<128x128xbf16>, vector<8x128xf32> -> vector<8x128xf32>
    %c0_15 = arith.constant 0 : index
    %c0_16 = arith.constant 0 : index
    %41 = vector.load %arg7[%c0_15, %c0_16] : memref<1x128xf32, #tpu.memory_space<vmem>>, vector<1x128xf32>
    %42 = vector.broadcast %41 : vector<1x128xf32> to vector<8x128xf32>
    %43 = arith.addf %40, %42 : vector<8x128xf32>
    %c0_17 = arith.constant 0 : index
    %c0_18 = arith.constant 0 : index
    %44 = vector.load %arg8[%c0_17, %c0_18] : memref<8x128xf32, #tpu.memory_space<vmem>>, vector<8x128xf32>
    tpu.vector_store %arg8[%c0_17, %c0_18], %43 {strides = array<i32>} : memref<8x128xf32, #tpu.memory_space<vmem>>, vector<8x128xf32>,
    return
  }
  func.func @transform_0(%arg0: i32) -> (i32, i32) {
    %c0_i32 = arith.constant 0 : i32
    %c0_i32_0 = arith.constant 0 : i32
    return %arg0, %c0_i32 : i32, i32
  }
  func.func @transform_1(%arg0: i32) -> (i32, i32) {
    %c0_i32 = arith.constant 0 : i32
    %c0_i32_0 = arith.constant 0 : i32
    %c0_i32_1 = arith.constant 0 : i32
    return %c0_i32, %c0_i32_0 : i32, i32
  }
  func.func @transform_2(%arg0: i32) -> (i32, i32) {
    %c0_i32 = arith.constant 0 : i32
    %c0_i32_0 = arith.constant 0 : i32
    %c0_i32_1 = arith.constant 0 : i32
    return %c0_i32, %c0_i32_0 : i32, i32
  }
  func.func @transform_3(%arg0: i32) -> (i32, i32) {
    %c0_i32 = arith.constant 0 : i32
    %c0_i32_0 = arith.constant 0 : i32
    %c0_i32_1 = arith.constant 0 : i32
    return %c0_i32, %c0_i32_0 : i32, i32
  }
  func.func @transform_4(%arg0: i32) -> (i32, i32) {
    %c0_i32 = arith.constant 0 : i32
    %c0_i32_0 = arith.constant 0 : i32
    %c0_i32_1 = arith.constant 0 : i32
    return %c0_i32, %c0_i32_0 : i32, i32
  }
  func.func @transform_5(%arg0: i32) -> (i32, i32) {
    %c0_i32 = arith.constant 0 : i32
    %c0_i32_0 = arith.constant 0 : i32
    %c0_i32_1 = arith.constant 0 : i32
    return %c0_i32, %c0_i32_0 : i32, i32
  }
  func.func @transform_6(%arg0: i32) -> (i32, i32) {
    %c0_i32 = arith.constant 0 : i32
    %c0_i32_0 = arith.constant 0 : i32
    %c0_i32_1 = arith.constant 0 : i32
    return %c0_i32, %c0_i32_0 : i32, i32
  }
  func.func @transform_7(%arg0: i32) -> (i32, i32) {
    %c0_i32 = arith.constant 0 : i32
    %c0_i32_0 = arith.constant 0 : i32
    return %arg0, %c0_i32 : i32, i32
  }
}

</mosaic_0001>

<bundles_post_ra>
// kernel: tpu_custom_call.1
= control target key start
LH: loop header
LB: loop body
LE: loop exit
PB: predicated region body
PF: predicated region fallthrough
CT: control target
= control target key end

     0   :  { %12 = vsyncpa [#allocation3], 0  ;;  %s2325_s0 = inlined_call_operand.vmem [shape: s32[16,16], index: 0, kind: input, shape index: {}]   ;;  %s2326_s1 = inlined_call_operand.vmem [shape: bf16[128,16], index: 1, kind: input, shape index: {}]   ;;  %s2327_s2 = inlined_call_operand.hbm [shape: bf16[80,128], index: 2, kind: input, shape index: {}]   ;;  %s2328_s3 = inlined_call_operand.vmem [shape: f32[1,128], index: 3, kind: input, shape index: {}]   ;;  %s2329_s4 = inlined_call_operand.hbm [shape: f32[16,128], index: 4, kind: input, shape index: {}]   ;;  %s2330_s5 = inlined_call_operand.vmem [shape: bf16[128,128], index: 5, kind: input, shape index: {}]   ;;  %s2331_s6 = inlined_call_operand.vmem [shape: f32[1,128], index: 6, kind: input, shape index: {}]   ;;  %s2332_s7 = inlined_call_operand.hbm [shape: f32[16,128], index: 7, kind: output, shape index: {}]  }
   0x1   :  { %13 = vsyncpa [#allocation6], 0 }
   0x2   :  { %14 = vsyncpa [#allocation4], 0 }
   0x3   :  { %16 = vsyncpa [#allocation4 + $0x1], 0  ;;  %s1875_s24 = smov 0   ;;  %s1877_s25 = smov 0  }
   0x4   :  { %s1879_s26 = smov 0   ;;  %s1881_s27 = smov 0  }
   0x5 LB: > { %s1896_s28 = sadd.s32 4294967295, %s1819_s27   ;;  %s1408_s29 = sadd.s32 4294967294, %s1819_s27   ;;  %s1819_s27 = sphi %s1881_s27, %s2352_s27   ;;  %s1815_s26 = sphi %s1879_s26, %s2351_s26   ;;  %s1811_s25 = sphi %s1877_s25, %s2350_s25   ;;  %s1807_s24 = sphi %s1875_s24, %s2349_s24  }
   0x6   : > { %s1900_s30 = sadd.s32 1, %s1819_s27   ;;  %s181_s8 = sadd.s32 1, %s1815_s26 }
   0x7   : > { %s178_s9 = ssub.s32 %s1819_s27, %s1900_s30  ;;  %p191_p0 = scmp.ne.s32.totalorder %s1815_s26, %s1811_s25 }
   0x8   : > { %p179_p1 = scmp.eq.s32.totalorder %s178_s9, 0  ;;  %p192_p2 = scmp.eq.s32.totalorder %s1896_s28, 1 }
   0x9   : > { %p197_p3 = scmp.ne.s32.totalorder %s1811_s25, %s1807_s24  ;;  %p198_p4 = scmp.eq.s32.totalorder %s1408_s29, 1 }
   0xa   : > { %s1911_s10 = scalar_select %p179_p1, %s1815_s26, %s181_s8  }
   0xb   : > { %p1913_p5 = por %p192_p2, %p191_p0  ;;  %p1917_p6 = por %p198_p4, %p197_p3 }
   0xc   : > { %2336 = sst [smem:[#allocation11_spill]] %s1911_s10  ;;  %p1409_p7 = scmp.ge.s32.totalorder %s1819_s27, 1 }
   0xd   : > { %s2337_s11 = scalar_select %p1913_p5, 1, 0 }
   0xe   : > { %s2338_s12 = scalar_select %p1917_p6, 1, 0 }
   0xf   : > { %p205_p8 = scmp.lt.s32.totalorder %s1819_s27, 3  ;;  %p2333_p9 = scmp.eq.s32.totalorder %s1896_s28, 0 }
  0x10   : > { %s1821_s14 = smov [#allocation2]   ;;  %s1822_s17 = smov [#allocation5]  }
  0x11   : > { %p1924_p10 = pnand %p1409_p7, %p205_p8  ;;  %s220_s15 = sshll.u32 %s1821_s14, 4  ;;  %s221_s15 = int_to_ptr.vmem [resolvable:$true] %s220_s15 }
  0x12   : > { %s236_s18 = sshll.u32 %s1822_s17, 4  ;;  %s1693_s21 = scalar_lea.hbm %s2327_s2, 640  ;;  %s1936_s18 = int_to_ptr.vmem [resolvable:$true] %s236_s18 }
  0x13   : > { %s2339_s13 = scalar_select %p1924_p10, 1, 0 }
  0x14   : > { %p1611_p11 = pneg %p1924_p10  ;;  %p1694_p13 = scmp.ne.s32.totalorder %s2327_s2, %s1693_s21 }
  0x15   : > { %p1700_p3 = scmp.lt.u32.totalorder %s1693_s21, %s2327_s2 }
  0x16   : > { %p1932_p12 = pnand %p2333_p9, %p1611_p11 }
  0x18   : > { %p1695_p0 = pneg %p1932_p12 }
  0x1a   : > { %p1696_p1 = pnand %p1695_p0, %p1694_p13 }
  0x1c   : > { %p1697_p2 = pneg %p1696_p1 }
  0x1e   : > { %p1702_p4 = pnand %p1700_p3, %p1697_p2 }
  0x20   : > { %1705 = shalt.err (!%p1702_p4)
}
  0x21   : > { %s1706_s9 = scalar_lea.vmem %s221_s15, 640  ;;  %p1714_p9 = scmp.lt.s32.totalorder %s221_s15, %s221_s15 }
  0x22   : > { %p1707_p7 = scmp.ne.s32.totalorder %s221_s15, %s1706_s9  ;;  %p1715_p6 = scmp.lt.s32.totalorder %s1706_s9, %s1706_s9 }
  0x24   : > { %p1709_p8 = pnand %p1707_p7, %p1695_p0  ;;  %p1716_p5 = por %p1715_p6, %p1714_p9 }
  0x26   : > { %p1710_p11 = pneg %p1709_p8 }
  0x28   : > { %p1717_p10 = pnand %p1716_p5, %p1710_p11 }
  0x2a   : > { %1720 = shalt.err (!%p1717_p10)
}
  0x2b   : > { %s1823_s14 = smov 64   ;;  %s1824_s17 = smov 4  }
  0x2c   : > { %1614 = dma.hbm_to_vmem [thread:$0]  (!%p1932_p12), %s2327_s2, 640, %s221_s15, [#allocation3], %s1823_s14, %s1823_s14, %s1824_s17  }
  0x2d   : > { %s1721_s23 = scalar_lea.hbm %s2329_s4, 256 }
  0x2e   : > { %p1722_p13 = scmp.ne.s32.totalorder %s2329_s4, %s1721_s23  ;;  %p1728_p9 = scmp.lt.u32.totalorder %s1721_s23, %s2329_s4 }
  0x30   : > { %p1724_p5 = pnand %p1722_p13, %p1695_p0 }
  0x32   : > { %p1725_p6 = pneg %p1724_p5 }
  0x34   : > { %p1730_p10 = pnand %p1728_p9, %p1725_p6 }
  0x36   : > { %1733 = shalt.err (!%p1730_p10)
}
  0x37   : > { %s1734_s15 = scalar_lea.vmem %s1936_s18, 256  ;;  %p1742_p4 = scmp.lt.s32.totalorder %s1936_s18, %s1936_s18 }
  0x38   : > { %p1735_p1 = scmp.ne.s32.totalorder %s1936_s18, %s1734_s15  ;;  %p1743_p7 = scmp.lt.s32.totalorder %s1734_s15, %s1734_s15 }
  0x3a   : > { %p1737_p2 = pnand %p1735_p1, %p1695_p0  ;;  %p1744_p8 = por %p1743_p7, %p1742_p4 }
  0x3c   : > { %p1738_p3 = pneg %p1737_p2 }
  0x3e   : > { %p1745_p11 = pnand %p1744_p8, %p1738_p3 }
  0x40   : > { %1748 = shalt.err (!%p1745_p11)
}
  0x41   : > { %s1825_s10 = smov 128   ;;  %s1826_s14 = smov 8  }
  0x42   : > { %1617 = dma.hbm_to_vmem [thread:$0]  (!%p1932_p12), %s2329_s4, 256, %s1936_s18, [#allocation6], %s1825_s10, %s1825_s10, %s1826_s14  }
  0x43   : > { %p2341_p13 = scmp.ne.s32.totalorder %s2339_s13, 0 }
  0x44   : > { %p2342_p0 = scmp.eq.s32.totalorder (!%p2341_p13), %s1896_s28, 0 }
  0x45   : > { %265 = sbr.rel (%p2341_p13) target bundleno = 1087 (0x43f), region = 48 }
  0x4c   : > { %1794 = dma.done.wait (%p2342_p0), [#allocation3], 640   ;;  %p2343_p5 = pmov %p2342_p0 }
  0x4d   : > { %p2344_p6 = pmov %p2342_p0 }
  0x4e   : > { %1796 = vsyncadd (%p2343_p5), [#allocation3], 4294966656 }
  0x4f   : > { %1798 = dma.done.wait (%p2344_p6), [#allocation6], 256   ;;  %p2345_p9 = pmov %p2342_p0 }
  0x50   : > { %p300_p10 = scmp.lt.s32.totalorder %s1896_s28, 1  ;;  %v306_v0 = vlaneseq  ;;  %v1672_v7 = vld [vmem:[%s2326_s1] sm:$0xff]   ;;  %v1673_v8 = vld [vmem:[%s2326_s1 + $0x8] sm:$0xff]   ;;  %v1674_v11 = vld [vmem:[%s2326_s1 + $0x10] sm:$0xff]   ;;  %v1827_v32 = vmov 1.0|1.0  }
  0x51   : > { %1800 = vsyncadd (%p2345_p9), [#allocation6], 4294967040  ;;  %1523 = vmatprep.subr.bf16.mxu0 %v1672_v7  ;;  %v1675_v15 = vld [vmem:[%s2326_s1 + $0x18] sm:$0xff]   ;;  %v1676_v17 = vld [vmem:[%s2326_s1 + $0x20] sm:$0xff]   ;;  %s1828_s23 = smov 32   ;;  %s1829_s29 = smov 64  }
  0x52   : > { %s301_s16 = scalar_select %p300_p10, %s1896_s28, 1  ;;  %v307_v1 = vshrl.u32 %v306_v0, 7  ;;  %1524 = vmatpush3.bf16.msra.mxu0 %v1672_v7  ;;  %v1677_v19 = vld [vmem:[%s2326_s1 + $0x28] sm:$0xff]   ;;  %v1678_v22 = vld [vmem:[%s2326_s1 + $0x30] sm:$0xff]   ;;  %v1679_v25 = vld [vmem:[%s2326_s1 + $0x38] sm:$0xff]   ;;  %v395_v29 = vand.u32 127, %v306_v0 }
  0x53   : > { %1525 = vmatprep.subr.bf16.mxu0 %v1673_v8  ;;  %v1680_v45 = vld [vmem:[#allocation2] sm:$0xff]   ;;  %v1681_v46 = vld [vmem:[#allocation2 + $0x8] sm:$0xff]   ;;  %v1682_v53 = vld [vmem:[#allocation2 + $0x10] sm:$0xff]   ;;  %s1830_s8 = smov 16   ;;  %s1831_s9 = smov 48  }
  0x54   : > { %s1417_s13 = sshll.u32 %s301_s16, 3  ;;  %v319_v2 = vsub.s32 1, %v307_v1  ;;  %v308_v3 = vsub.s32 0, %v307_v1  ;;  %v330_v9 = vsub.s32 2, %v307_v1  ;;  %v341_v10 = vsub.s32 3, %v307_v1  ;;  %1555 = vmatprep.subr.bf16.mxu1 %v1680_v45  ;;  %s297_s17 = sand.u32 1, %s1811_s25  }
  0x55   : > { %s303_s21 = scalar_lea.vmem %s2325_s0, %s1417_s13  ;;  %v352_v13 = vsub.s32 4, %v307_v1  ;;  %v363_v14 = vsub.s32 5, %v307_v1  ;;  %v374_v21 = vsub.s32 6, %v307_v1  ;;  %v385_v24 = vsub.s32 7, %v307_v1  ;;  %1556 = vmatpush3.bf16.msra.mxu1 %v1680_v45  ;;  %v1683_v1 = vld [vmem:[#allocation2 + $0x18] sm:$0xff]   ;;  %s1416_s19 = sshll.u32 %s297_s17, 3 }
  0x56   : > { %v305_v4 = vld [vmem:[%s303_s21] sm:$0xff]  ;;  %1526 = vmatpush3.bf16.msra.mxu0 %v1673_v8  ;;  %1557 = vmatprep.subr.bf16.mxu1 %v1681_v46  ;;  %s1482_s18 = sshll.u32 %s1896_s28, 7  ;;  %s299_s20 = scalar_lea.vmem [#allocation7], %s1416_s19 }
  0x57   : > { %v320_v5 = vrot.slane %v305_v4, %v319_v2  ;;  %v309_v6 = vrot.slane %v305_v4, %v308_v3  ;;  %v331_v12 = vrot.slane %v305_v4, %v330_v9  ;;  %1527 = vmatprep.subr.bf16.mxu0 %v1674_v11  ;;  %v342_v16 = vrot.slane %v305_v4, %v341_v10  ;;  %s1327_s21 = sshll.u32 %s299_s20, 4  ;;  %p2346_p1 = scmp.ne.s32.totalorder %s2337_s11, 0  ;;  %s2285_s21 = int_to_ptr.vmem [resolvable:$true] %s1327_s21 }
  0x58   : > { %v353_v18 = vrot.slane %v305_v4, %v352_v13  ;;  %v364_v20 = vrot.slane %v305_v4, %v363_v14  ;;  %v375_v23 = vrot.slane %v305_v4, %v374_v21  ;;  %v386_v26 = vrot.slane %v305_v4, %v385_v24  ;;  %v1684_v13 = vld [vmem:[#allocation2 + $0x20] sm:$0xff]   ;;  %s1749_s28 = scalar_lea.vmem %s2285_s21, 128 }
  0x59   : > { %322 = vbcast.lane.b32.xlu1 %v320_v5, 256  ;;  %311 = vbcast.lane.b32.xlu0 %v309_v6, 256  ;;  %p1750_p12 = scmp.ne.s32.totalorder %s2285_s21, %s1749_s28 }
  0x5a   : > { %1528 = vmatpush3.bf16.msra.mxu0 %v1674_v11  ;;  %1558 = vmatpush3.bf16.msra.mxu1 %v1681_v46 }
  0x5b   : > { %1529 = vmatprep.subr.bf16.mxu0 %v1675_v15  ;;  %1559 = vmatprep.subr.bf16.mxu1 %v1682_v53  ;;  %p1751_p2 = pnand %p1750_p12, %p2346_p1 }
  0x5d   : > { %326 = vbcast.lane.b32.xlu1 %v320_v5, 264  ;;  %315 = vbcast.lane.b32.xlu0 %v309_v6, 264  ;;  %p1752_p3 = pneg %p1751_p2 }
  0x5e   : > { %1530 = vmatpush3.bf16.msra.mxu0 %v1675_v15  ;;  %1560 = vmatpush3.bf16.msra.mxu1 %v1682_v53 }
  0x5f   : > { %1531 = vmatprep.subr.bf16.mxu0 %v1676_v17  ;;  %1561 = vmatprep.subr.bf16.mxu1 %v1683_v1 }
  0x61   : > { %337 = vbcast.lane.b32.xlu1 %v331_v12, 264  ;;  %333 = vbcast.lane.b32.xlu0 %v331_v12, 256 }
  0x62   : > { %1532 = vmatpush3.bf16.msra.mxu0 %v1676_v17  ;;  %1562 = vmatpush3.bf16.msra.mxu1 %v1683_v1 }
  0x63   : > { %1533 = vmatprep.subr.bf16.mxu0 %v1677_v19  ;;  %1563 = vmatprep.subr.bf16.mxu1 %v1684_v13 }
  0x65   : > { %348 = vbcast.lane.b32.xlu1 %v342_v16, 264  ;;  %344 = vbcast.lane.b32.xlu0 %v342_v16, 256 }
  0x66   : > { %1534 = vmatpush3.bf16.msra.mxu0 %v1677_v19  ;;  %1564 = vmatpush3.bf16.msra.mxu1 %v1684_v13 }
  0x67   : > { %1535 = vmatprep.subr.bf16.mxu0 %v1678_v22 }
  0x69   : > { %359 = vbcast.lane.b32.xlu1 %v353_v18, 264  ;;  %355 = vbcast.lane.b32.xlu0 %v353_v18, 256 }
  0x6a   : > { %1536 = vmatpush3.bf16.msra.mxu0 %v1678_v22 }
  0x6b   : > { %1537 = vmatprep.subr.bf16.mxu0 %v1679_v25 }
  0x6d   : > { %370 = vbcast.lane.b32.xlu1 %v364_v20, 264  ;;  %366 = vbcast.lane.b32.xlu0 %v364_v20, 256 }
  0x6e   : > { %1538 = vmatpush3.bf16.msra.mxu0 %v1679_v25 }
  0x71   : > { %381 = vbcast.lane.b32.xlu1 %v375_v23, 264  ;;  %377 = vbcast.lane.b32.xlu0 %v375_v23, 256 }
  0x75   : > { %392 = vbcast.lane.b32.xlu1 %v386_v26, 264  ;;  %388 = vbcast.lane.b32.xlu0 %v386_v26, 256 }
  0xcb   : > { %v323_v27 = vpop.permute.xlu1 %322  ;;  %v312_v28 = vpop.permute.xlu0 %311 }
  0xcc   : > { %vm398_vm0 = vcmp.eq.s32.totalorder %v323_v27, %v395_v29  ;;  %vm396_vm3 = vcmp.eq.s32.totalorder %v312_v28, %v395_v29 }
  0xcf   : > { %v327_v30 = vpop.permute.xlu1 %326  ;;  %v316_v31 = vpop.permute.xlu0 %315 }
  0xd0   : > { %vm399_vm1 = vcmp.eq.s32.totalorder %v327_v30, %v395_v29  ;;  %vm397_vm2 = vcmp.eq.s32.totalorder %v316_v31, %v395_v29 }
  0xd1   : > { %vm1444_vm4 = vmpackc.low %vm399_vm1, %vm398_vm0 }
  0xd2   : > { %vm1442_vm5 = vmpackc.low %vm397_vm2, %vm396_vm3 }
  0xd3   : > { %1539 = vmatprep.mubr.msk.bf16.mxu0 %vm1442_vm5, %v1827_v32  ;;  %v338_v33 = vpop.permute.xlu1 %337  ;;  %v334_v34 = vpop.permute.xlu0 %333 }
  0xd4   : > { %1540 = vmatmul.mubr.msk.bf16.vlgmr.msra.gmra.mrb[0].mxu0 %vm1444_vm4, %v1827_v32  ;;  %vm401_vm6 = vcmp.eq.s32.totalorder %v338_v33, %v395_v29  ;;  %vm400_vm7 = vcmp.eq.s32.totalorder %v334_v34, %v395_v29 }
  0xd5   : > { %vm1446_vm8 = vmpackc.low %vm401_vm6, %vm400_vm7 }
  0xd6   : > { %1543 = vmatprep.mubr.msk.bf16.mxu0 %vm1446_vm8, %v1827_v32  ;;  %vm698_vm8 = vcmask 1046528  }
  0xd7   : > { %v349_v35 = vpop.permute.xlu1 %348  ;;  %v345_v36 = vpop.permute.xlu0 %344 }
  0xd8   : > { %vm403_vm9 = vcmp.eq.s32.totalorder %v349_v35, %v395_v29  ;;  %vm402_vm10 = vcmp.eq.s32.totalorder %v345_v36, %v395_v29 }
  0xd9   : > { %vm1448_vm11 = vmpackc.low %vm403_vm9, %vm402_vm10  ;;  %vm754_vm9 = vcmask 1045504   ;;  %vm621_vm10 = vsmask.f32 7424 }
  0xdb   : > { %v360_v37 = vpop.permute.xlu1 %359  ;;  %v356_v38 = vpop.permute.xlu0 %355 }
  0xdc   : > { %1544 = vmatmul.mubr.msk.bf16.gmra.mrb[4].mxu0 %vm1448_vm11, %v1827_v32  ;;  %vm405_vm12 = vcmp.eq.s32.totalorder %v360_v37, %v395_v29  ;;  %vm404_vm13 = vcmp.eq.s32.totalorder %v356_v38, %v395_v29  ;;  %vm718_vm11 = vsmask.f32 6400 }
  0xdd   : > { %vm1450_vm14 = vmpackc.low %vm405_vm12, %vm404_vm13  ;;  %vm687_vm12 = vcmask 1047552  }
  0xde   : > { %1547 = vmatprep.mubr.msk.bf16.mxu0 %vm1450_vm14, %v1827_v32  ;;  %vm688_vm13 = vmand %vm687_vm12, %vm621_vm10 }
  0xdf   : > { %v371_v39 = vpop.permute.xlu1 %370  ;;  %v367_v40 = vpop.permute.xlu0 %366  ;;  %vm752_vm14 = vmand %vm698_vm8, %vm718_vm11 }
  0xe0   : > { %vm407_vm15 = vcmp.eq.s32.totalorder %v371_v39, %v395_v29  ;;  %vm406_vm0 = vcmp.eq.s32.totalorder %v367_v40, %v395_v29 }
  0xe1   : > { %vm1452_vm1 = vmpackc.low %vm407_vm15, %vm406_vm0  ;;  %vm842_vm15 = vcmask 130048   ;;  %vm859_vm0 = vcmask 261120  }
  0xe3   : > { %v382_v41 = vpop.permute.xlu1 %381  ;;  %v378_v42 = vpop.permute.xlu0 %377 }
  0xe4   : > { %1548 = vmatmul.mubr.msk.bf16.gmra.mrb[8].mxu0 %vm1452_vm1, %v1827_v32  ;;  %vm409_vm2 = vcmp.eq.s32.totalorder %v382_v41, %v395_v29  ;;  %vm408_vm3 = vcmp.eq.s32.totalorder %v378_v42, %v395_v29  ;;  %vm876_vm1 = vcmask 392192  }
  0xe5   : > { %vm1454_vm4 = vmpackc.low %vm409_vm2, %vm408_vm3  ;;  %vm893_vm2 = vcmask 523264   ;;  %vm957_vm3 = vcmask 654336  }
  0xe6   : > { %1551 = vmatprep.mubr.msk.bf16.mxu0 %vm1454_vm4, %v1827_v32  ;;  %vm1833_vm4 = vmmov 0  }
  0xe7   : > { %v393_v43 = vpop.permute.xlu1 %392  ;;  %v389_v44 = vpop.permute.xlu0 %388 }
  0xe8   : > { %vm411_vm5 = vcmp.eq.s32.totalorder %v393_v43, %v395_v29  ;;  %vm410_vm6 = vcmp.eq.s32.totalorder %v389_v44, %v395_v29 }
  0xe9   : > { %vm1456_vm7 = vmpackc.low %vm411_vm5, %vm410_vm6  ;;  %vm1208_vm5 = vcmask 1041409   ;;  %vm1210_vm6 = vcmask 1042434  }
  0xec   : > { %1552 = vmatmul.mubr.msk.bf16.gmra.mrb[12].mxu0 %vm1456_vm7, %v1827_v32  ;;  %vm1212_vm7 = vcmask 1043459  }
 0x1a7   : > { %v1541_v47 = vpop.f32.mrb[0].mxu0 }
 0x1a8   : > { %v550_v48 = vpop.f32.mrb[1].mxu0 }
 0x1a9   : > { %v1542_v49 = vpop.f32.mrb[2].mxu0 }
 0x1aa   : > { %v2026_v50 = vpack.c.bf16 %v1542_v49, %v1541_v47  ;;  %v553_v51 = vpop.f32.mrb[3].mxu0 }
 0x1ab   : > { %v2028_v52 = vpack.c.bf16 %v553_v51, %v550_v48 }
 0x1ac   : > { %v700_v54 = vrot.slane %v2026_v50, 1  ;;  %v634_v57 = vshrl.u32 %v2026_v50, 16  ;;  %v630_v59 = vshll.u32 %v2026_v50, 16  ;;  %v756_v63 = vrot.slane %v2026_v50, 2 }
 0x1ad   : > { %v699_v55 = vrot.slane %v2028_v52, 1  ;;  %v625_v56 = vshll.u32 %v2028_v52, 16  ;;  %v623_v58 = vshrl.u32 %v2028_v52, 16  ;;  %v755_v62 = vrot.slane %v2028_v52, 2 }
 0x1ae   : > { %v722_v4 = vrot.slane %v634_v57, 1  ;;  %v723_v9 = vrot.slane %v630_v59, 2  ;;  %v632_v14 = vrot.slane %v630_v59, 1 }
 0x1af   : > { %v1545_v60 = vpop.f32.mrb[4].mxu0  ;;  %v701_v61 = vsel %vm698_vm8, %v699_v55, %v700_v54  ;;  %v2041_v0 = vrot.slane %v625_v56, 1  ;;  %v719_v7 = vrot.slane %v623_v58, 1  ;;  %v720_v8 = vrot.slane %v625_v56, 2 }
 0x1b0   : > { %792 = vrot.lane.b32.xlu0 %v701_v61, %s1828_s23  ;;  %v566_v2 = vpop.f32.mrb[5].mxu0  ;;  %v757_v11 = vsel %vm754_vm9, %v755_v62, %v756_v63  ;;  %v724_v17 = vor.u32 %v723_v9, %v722_v4  ;;  %v636_v35 = vor.u32 %v634_v57, %v632_v14 }
 0x1b1   : > { %v1546_v3 = vpop.f32.mrb[6].mxu0  ;;  %v628_v12 = vor.u32 %v2041_v0, %v623_v58  ;;  %v2054_v16 = vor.u32 %v720_v8, %v719_v7 }
 0x1b2   : > { %v2044_v5 = vpack.c.bf16 %v1546_v3, %v1545_v60  ;;  %v569_v6 = vpop.f32.mrb[7].mxu0 }
 0x1b3   : > { %v2046_v10 = vpack.c.bf16 %v569_v6, %v566_v2  ;;  %v633_v20 = vsel %vm621_vm10, %v628_v12, %v632_v14  ;;  %v725_v28 = vsel %vm718_vm11, %v2054_v16, %v724_v17 }
 0x1b4   : > { %826 = vrot.lane.b32.xlu0 %v757_v11, %s1829_s29  ;;  %v704_v30 = vrot.slane %v2044_v5, 1  ;;  %v760_v36 = vrot.slane %v2044_v5, 2  ;;  %v646_v37 = vshll.u32 %v2044_v5, 16  ;;  %v650_v38 = vshrl.u32 %v2044_v5, 16 }
 0x1b5   : > { %v702_v15 = vrot.slane %v2046_v10, 1  ;;  %v758_v18 = vrot.slane %v2046_v10, 2  ;;  %v638_v22 = vshll.u32 %v2046_v10, 16  ;;  %v642_v23 = vshrl.u32 %v2046_v10, 16 }
 0x1b6   : > { %v730_v48 = vrot.slane %v650_v38, 1  ;;  %v731_v49 = vrot.slane %v646_v37, 2  ;;  %v648_v57 = vrot.slane %v646_v37, 1 }
 0x1b7   : > { %v1549_v19 = vpop.f32.mrb[8].mxu0  ;;  %v703_v21 = vsel %vm698_vm8, %v700_v54, %v702_v15  ;;  %v759_v29 = vsel %vm754_vm9, %v756_v63, %v758_v18  ;;  %v640_v32 = vrot.slane %v638_v22, 1  ;;  %v726_v33 = vrot.slane %v642_v23, 1 }
 0x1b8   : > { %775 = vrot.lane.b32.xlu0 %v633_v20, %s1830_s8  ;;  %794 = vrot.lane.b32.xlu1 %v703_v21, %s1828_s23  ;;  %v582_v24 = vpop.f32.mrb[9].mxu0  ;;  %v727_v34 = vrot.slane %v638_v22, 2  ;;  %v705_v40 = vsel %vm698_vm8, %v702_v15, %v704_v30  ;;  %v761_v47 = vsel %vm754_vm9, %v758_v18, %v760_v36  ;;  %v732_v58 = vor.u32 %v731_v49, %v730_v48 }
 0x1b9   : > { %v1550_v25 = vpop.f32.mrb[10].mxu0  ;;  %v641_v41 = vsel %vm621_vm10, %v636_v35, %v640_v32  ;;  %v644_v54 = vor.u32 %v642_v23, %v640_v32  ;;  %v652_v12 = vor.u32 %v650_v38, %v648_v57 }
 0x1ba   : > { %v2063_v26 = vpack.c.bf16 %v1550_v25, %v1549_v19  ;;  %v585_v27 = vpop.f32.mrb[11].mxu0  ;;  %v728_v42 = vor.u32 %v727_v34, %v726_v33 }
 0x1bb   : > { %v2069_v31 = vpack.c.bf16 %v585_v27, %v582_v24  ;;  %v649_v60 = vsel %vm621_vm10, %v644_v54, %v648_v57 }
 0x1bc   : > { %809 = vrot.lane.b32.xlu0 %v725_v28, %s1831_s9  ;;  %828 = vrot.lane.b32.xlu1 %v759_v29, %s1829_s29  ;;  %v729_v53 = vsel %vm718_vm11, %v724_v17, %v728_v42  ;;  %v733_v3 = vsel %vm718_vm11, %v728_v42, %v732_v58  ;;  %v708_v6 = vrot.slane %v2063_v26, 1  ;;  %v764_v13 = vrot.slane %v2063_v26, 2 }
 0x1bd   : > { %v706_v56 = vrot.slane %v2069_v31, 1  ;;  %v762_v59 = vrot.slane %v2069_v31, 2  ;;  %v654_v63 = vshll.u32 %v2069_v31, 16  ;;  %v658_v1 = vshrl.u32 %v2069_v31, 16 }
 0x1be   : > { %v666_v18 = vshrl.u32 %v2063_v26, 16 }
 0x1bf   : > { %v1553_v39 = vpop.f32.mrb[12].mxu0  ;;  %v707_v61 = vsel %vm698_vm8, %v704_v30, %v706_v56  ;;  %v763_v4 = vsel %vm754_vm9, %v760_v36, %v762_v59  ;;  %v656_v7 = vrot.slane %v654_v63, 1  ;;  %v734_v8 = vrot.slane %v658_v1, 1 }
 0x1c0   : > { %796 = vrot.lane.b32.xlu0 %v705_v40, %s1828_s23  ;;  %777 = vrot.lane.b32.xlu1 %v641_v41, %s1830_s8  ;;  %v598_v43 = vpop.f32.mrb[13].mxu0  ;;  %v735_v9 = vrot.slane %v654_v63, 2  ;;  %v709_v14 = vsel %vm698_vm8, %v706_v56, %v708_v6  ;;  %v765_v19 = vsel %vm754_vm9, %v762_v59, %v764_v13  ;;  %v738_v23 = vrot.slane %v666_v18, 1 }
 0x1c1   : > { %v1554_v44 = vpop.f32.mrb[14].mxu0  ;;  %v657_v15 = vsel %vm621_vm10, %v652_v12, %v656_v7  ;;  %v660_v20 = vor.u32 %v658_v1, %v656_v7 }
 0x1c2   : > { %v2080_v45 = vpack.c.bf16 %v1554_v44, %v1553_v39  ;;  %v601_v46 = vpop.f32.mrb[15].mxu0  ;;  %v736_v17 = vor.u32 %v735_v9, %v734_v8 }
 0x1c3   : > { %v2083_v51 = vpack.c.bf16 %v601_v46, %v598_v43 }
 0x1c4   : > { %830 = vrot.lane.b32.xlu0 %v761_v47, %s1829_s29  ;;  %811 = vrot.lane.b32.xlu1 %v729_v53, %s1831_s9  ;;  %v768_v2 = vrot.slane %v2080_v45, 2  ;;  %v737_v21 = vsel %vm718_vm11, %v732_v58, %v736_v17  ;;  %v678_v28 = vshll.u32 %v2080_v45, 16  ;;  %v712_v39 = vrot.slane %v2080_v45, 1 }
 0x1c5   : > { %v710_v22 = vrot.slane %v2083_v51, 1  ;;  %v766_v32 = vrot.slane %v2083_v51, 2  ;;  %v670_v33 = vshll.u32 %v2083_v51, 16  ;;  %v674_v38 = vshrl.u32 %v2083_v51, 16 }
 0x1c6   : > { %v2105_v11 = vsel %vm754_vm9, %v768_v2, %v755_v62  ;;  %v662_v62 = vshll.u32 %v2063_v26, 16  ;;  %v680_v34 = vrot.slane %v678_v28, 1  ;;  %v682_v40 = vshrl.u32 %v2080_v45, 16 }
 0x1c7   : > { %v711_v29 = vsel %vm698_vm8, %v708_v6, %v710_v22  ;;  %v767_v36 = vsel %vm754_vm9, %v764_v13, %v766_v32  ;;  %v672_v37 = vrot.slane %v670_v33, 1  ;;  %v713_v42 = vsel %vm698_vm8, %v710_v22, %v712_v39 }
 0x1c8   : > { %779 = vrot.lane.b32.xlu0 %v649_v60, %s1830_s8  ;;  %798 = vrot.lane.b32.xlu1 %v707_v61, %s1828_s23  ;;  %v739_v24 = vrot.slane %v662_v62, 2  ;;  %v664_v25 = vrot.slane %v662_v62, 1  ;;  %v684_v43 = vor.u32 %v682_v40, %v680_v34  ;;  %v742_v47 = vrot.slane %v674_v38, 1 }
 0x1c9   : > { %v676_v46 = vor.u32 %v674_v38, %v672_v37  ;;  %v743_v48 = vrot.slane %v670_v33, 2  ;;  %v746_v49 = vrot.slane %v682_v40, 1  ;;  %v747_v53 = vrot.slane %v678_v28, 2 }
 0x1ca   : > { %v665_v27 = vsel %vm621_vm10, %v660_v20, %v664_v25  ;;  %v740_v30 = vor.u32 %v739_v24, %v738_v23  ;;  %v668_v41 = vor.u32 %v666_v18, %v664_v25  ;;  %v689_v56 = vsel %vm688_vm13, %v684_v43, %v2041_v0 }
 0x1cb   : > { %v681_v54 = vsel %vm621_vm10, %v676_v46, %v680_v34  ;;  %v744_v57 = vor.u32 %v743_v48, %v742_v47  ;;  %v748_v58 = vor.u32 %v747_v53, %v746_v49  ;;  %v769_v61 = vsel %vm754_vm9, %v766_v32, %v768_v2 }
 0x1cc   : > { %813 = vrot.lane.b32.xlu0 %v733_v3, %s1831_s9  ;;  %832 = vrot.lane.b32.xlu1 %v763_v4, %s1829_s29  ;;  %v741_v35 = vsel %vm718_vm11, %v736_v17, %v740_v30  ;;  %v673_v44 = vsel %vm621_vm10, %v668_v41, %v672_v37  ;;  %v717_v0 = vsel %vm698_vm8, %v712_v39, %v699_v55  ;;  %vm1214_vm8 = vcmask 1044484  }
 0x1cd   : > { %v749_v59 = vsel %vm718_vm11, %v744_v57, %v748_v58  ;;  %v745_v60 = vsel %vm718_vm11, %v740_v30, %v744_v57  ;;  %v753_v63 = vsel %vm752_vm14, %v748_v58, %v2054_v16  ;;  %vm1216_vm9 = vcmask 1045509  }
 0x1ce   : > { %vm1218_vm10 = vcmask 1046534   ;;  %vm1220_vm11 = vcmask 1047559  }
 0x1d0   : > { %800 = vrot.lane.b32.xlu0 %v709_v14, %s1828_s23  ;;  %781 = vrot.lane.b32.xlu1 %v657_v15, %s1830_s8 }
 0x1d4   : > { %834 = vrot.lane.b32.xlu0 %v765_v19, %s1829_s29  ;;  %815 = vrot.lane.b32.xlu1 %v737_v21, %s1831_s9 }
 0x1d8   : > { %783 = vrot.lane.b32.xlu0 %v665_v27, %s1830_s8  ;;  %802 = vrot.lane.b32.xlu1 %v711_v29, %s1828_s23 }
 0x1dc   : > { %817 = vrot.lane.b32.xlu0 %v741_v35, %s1831_s9  ;;  %836 = vrot.lane.b32.xlu1 %v767_v36, %s1829_s29 }
 0x1e0   : > { %804 = vrot.lane.b32.xlu0 %v713_v42, %s1828_s23  ;;  %785 = vrot.lane.b32.xlu1 %v673_v44, %s1830_s8 }
 0x1e4   : > { %787 = vrot.lane.b32.xlu0 %v681_v54, %s1830_s8  ;;  %789 = vrot.lane.b32.xlu1 %v689_v56, %s1830_s8  ;;  %s1314_s8 = scalar_lea.sflag [#allocation4], %s297_s17 }
 0x1e8   : > { %821 = vrot.lane.b32.xlu0 %v749_v59, %s1831_s9  ;;  %819 = vrot.lane.b32.xlu1 %v745_v60, %s1831_s9 }
 0x1ec   : > { %838 = vrot.lane.b32.xlu0 %v769_v61, %s1829_s29  ;;  %806 = vrot.lane.b32.xlu1 %v717_v0, %s1828_s23 }
 0x1f0   : > { %823 = vrot.lane.b32.xlu1 %v753_v63, %s1831_s9  ;;  %s1834_s9 = smov [#allocation7]  }
 0x1f1   : > { %s1753_s15 = sshll.u32 %s1834_s9, 4  ;;  %s1754_s15 = int_to_ptr.vmem [resolvable:$false] %s1753_s15 }
 0x1f2   : > { %s1755_s10 = scalar_lea.vmem %s1754_s15, 256  ;;  %p1756_p4 = scmp.lt.s32.totalorder %s2285_s21, %s1754_s15 }
 0x1f3   : > { %p1757_p7 = scmp.lt.s32.totalorder %s1755_s10, %s1749_s28 }
 0x1f4   : > { %840 = vrot.lane.b32.xlu1 %v2105_v11, %s1829_s29  ;;  %s2283_s29 = scalar_lea.hbm %s2332_s7, %s1482_s18 }
 0x1f5   : > { %p1758_p8 = por %p1757_p7, %p1756_p4 }
 0x1f7   : > { %p1759_p11 = pnand %p1758_p8, %p1752_p3 }
 0x222   : > { %v793_v1 = vpop.permute.xlu0 %792 }
 0x226   : > { %v827_v2 = vpop.permute.xlu0 %826 }
 0x22a   : > { %v795_v3 = vpop.permute.xlu1 %794  ;;  %v776_v4 = vpop.permute.xlu0 %775 }
 0x22b   : > { %v844_v55 = vsel %vm842_vm15, %v2028_v52, %v776_v4  ;;  %v1687_v4 = vld [vmem:[%s2330_s5 + $0x10] sm:$0xff]  }
 0x22c   : > { %v861_v7 = vsel %vm859_vm0, %v844_v55, %v793_v1  ;;  %v1688_v55 = vld [vmem:[%s2330_s5 + $0x18] sm:$0xff]  }
 0x22e   : > { %v829_v6 = vpop.permute.xlu1 %828  ;;  %v810_v16 = vpop.permute.xlu0 %809 }
 0x22f   : > { %v878_v8 = vsel %vm876_vm1, %v861_v7, %v810_v16  ;;  %v1690_v7 = vld [vmem:[%s2330_s5 + $0x28] sm:$0xff]   ;;  %v1691_v16 = vld [vmem:[%s2330_s5 + $0x30] sm:$0xff]  }
 0x230   : > { %v895_v9 = vsel %vm893_vm2, %v878_v8, %v827_v2  ;;  %v1685_v2 = vld [vmem:[%s2330_s5] sm:$0xff]   ;;  %v1692_v8 = vld [vmem:[%s2330_s5 + $0x38] sm:$0xff]  }
 0x231   : > { %1565 = vmatprep.mubr.msk.bf16.mxu1 %vm957_vm3, %v895_v9  ;;  %v2237_v9 = vld [vmem:[%s2328_s3] ss:$0 sm:$0xff] }
 0x232   : > { %v778_v11 = vpop.permute.xlu1 %777  ;;  %v797_v12 = vpop.permute.xlu0 %796 }
 0x233   : > { %v846_v13 = vsel %vm842_vm15, %v2026_v50, %v778_v11 }
 0x234   : > { %v863_v52 = vsel %vm859_vm0, %v846_v13, %v795_v3  ;;  %v1832_v3 = vmov 0.0  }
 0x235   : > { %1581 = vmatprep.subr.bf16.mxu1 %v1832_v3 }
 0x236   : > { %v812_v14 = vpop.permute.xlu1 %811  ;;  %v831_v15 = vpop.permute.xlu0 %830 }
 0x237   : > { %v880_v17 = vsel %vm876_vm1, %v863_v52, %v812_v14 }
 0x238   : > { %v897_v18 = vsel %vm893_vm2, %v880_v17, %v829_v6  ;;  %v1689_v6 = vld [vmem:[%s2330_s5 + $0x20] sm:$0xff]  }
 0x239   : > { %1566 = vmatmul.mubr.msk.bf16.vlgmr.msra.gmra.mrb[0].mxu1 %vm957_vm3, %v897_v18 }
 0x23a   : > { %v799_v62 = vpop.permute.xlu1 %798  ;;  %v780_v19 = vpop.permute.xlu0 %779  ;;  %1582 = vmatpush3.bf16.msra.mxu1 %v1685_v2 }
 0x23b   : > { %v848_v20 = vsel %vm842_vm15, %v2046_v10, %v780_v19  ;;  %1583 = vmatprep.subr.bf16.mxu1 %v1832_v3 }
 0x23c   : > { %v865_v22 = vsel %vm859_vm0, %v848_v20, %v797_v12  ;;  %v2244_v20 = vld [vmem:[#allocation5 + $0x8] sm:$0xff] }
 0x23e   : > { %v833_v21 = vpop.permute.xlu1 %832  ;;  %v814_v23 = vpop.permute.xlu0 %813 }
 0x23f   : > { %v882_v50 = vsel %vm876_vm1, %v865_v22, %v814_v23 }
 0x240   : > { %v899_v24 = vsel %vm893_vm2, %v882_v50, %v831_v15 }
 0x241   : > { %1569 = vmatprep.mubr.msk.bf16.mxu1 %vm957_vm3, %v899_v24 }
 0x242   : > { %v782_v25 = vpop.permute.xlu1 %781  ;;  %v801_v27 = vpop.permute.xlu0 %800 }
 0x243   : > { %v850_v28 = vsel %vm842_vm15, %v2044_v5, %v782_v25 }
 0x244   : > { %v867_v29 = vsel %vm859_vm0, %v850_v28, %v799_v62  ;;  %v2242_v62 = vld [vmem:[#allocation5] sm:$0xff] }
 0x246   : > { %v816_v30 = vpop.permute.xlu1 %815  ;;  %v835_v32 = vpop.permute.xlu0 %834 }
 0x247   : > { %v884_v10 = vsel %vm876_vm1, %v867_v29, %v816_v30 }
 0x248   : > { %v901_v33 = vsel %vm893_vm2, %v884_v10, %v833_v21 }
 0x249   : > { %1570 = vmatmul.mubr.msk.bf16.gmra.mrb[4].mxu1 %vm957_vm3, %v901_v33 }
 0x24a   : > { %v803_v34 = vpop.permute.xlu1 %802  ;;  %v784_v35 = vpop.permute.xlu0 %783 }
 0x24b   : > { %v852_v36 = vsel %vm842_vm15, %v2069_v31, %v784_v35 }
 0x24c   : > { %v869_v38 = vsel %vm859_vm0, %v852_v36, %v801_v27 }
 0x24e   : > { %v837_v37 = vpop.permute.xlu1 %836  ;;  %v818_v39 = vpop.permute.xlu0 %817 }
 0x24f   : > { %v886_v5 = vsel %vm876_vm1, %v869_v38, %v818_v39 }
 0x250   : > { %v903_v40 = vsel %vm893_vm2, %v886_v5, %v835_v32 }
 0x251   : > { %1573 = vmatprep.mubr.msk.bf16.mxu1 %vm957_vm3, %v903_v40 }
 0x252   : > { %v786_v41 = vpop.permute.xlu1 %785  ;;  %v805_v42 = vpop.permute.xlu0 %804 }
 0x253   : > { %v854_v46 = vsel %vm842_vm15, %v2063_v26, %v786_v41 }
 0x254   : > { %v871_v47 = vsel %vm859_vm0, %v854_v46, %v803_v34 }
 0x256   : > { %v790_v43 = vpop.permute.xlu1 %789  ;;  %v788_v44 = vpop.permute.xlu0 %787 }
 0x257   : > { %v856_v31 = vsel %vm842_vm15, %v2083_v51, %v788_v44  ;;  %v858_v60 = vsel %vm842_vm15, %v2080_v45, %v790_v43  ;;  %v1686_v45 = vld [vmem:[%s2330_s5 + $0x8] sm:$0xff]  }
 0x258   : > { %v873_v56 = vsel %vm859_vm0, %v856_v31, %v805_v42  ;;  %1584 = vmatpush3.bf16.msra.mxu1 %v1686_v45 }
 0x259   : > { %1585 = vmatprep.subr.bf16.mxu1 %v1832_v3 }
 0x25a   : > { %v820_v48 = vpop.permute.xlu1 %819  ;;  %v822_v49 = vpop.permute.xlu0 %821 }
 0x25b   : > { %v888_v53 = vsel %vm876_vm1, %v871_v47, %v820_v48  ;;  %v890_v57 = vsel %vm876_vm1, %v873_v56, %v822_v49 }
 0x25c   : > { %v905_v54 = vsel %vm893_vm2, %v888_v53, %v837_v37  ;;  %1586 = vmatpush3.bf16.msra.mxu1 %v1687_v4 }
 0x25d   : > { %1574 = vmatmul.mubr.msk.bf16.gmra.mrb[8].mxu1 %vm957_vm3, %v905_v54  ;;  %1587 = vmatprep.subr.bf16.mxu1 %v1832_v3 }
 0x25e   : > { %v807_v58 = vpop.permute.xlu1 %806  ;;  %v839_v59 = vpop.permute.xlu0 %838 }
 0x25f   : > { %v907_v26 = vsel %vm893_vm2, %v890_v57, %v839_v59  ;;  %v875_v61 = vsel %vm859_vm0, %v858_v60, %v807_v58 }
 0x260   : > { %1577 = vmatprep.mubr.msk.bf16.mxu1 %vm957_vm3, %v907_v26  ;;  %1588 = vmatpush3.bf16.msra.mxu1 %v1688_v55 }
 0x261   : > { %1589 = vmatprep.subr.bf16.mxu1 %v1832_v3 }
 0x262   : > { %v824_v51 = vpop.permute.xlu1 %823 }
 0x263   : > { %v892_v0 = vsel %vm876_vm1, %v875_v61, %v824_v51 }
 0x264   : > { %1590 = vmatpush3.bf16.msra.mxu1 %v1689_v6 }
 0x265   : > { %1591 = vmatprep.subr.bf16.mxu1 %v1832_v3 }
 0x266   : > { %v841_v63 = vpop.permute.xlu1 %840 }
 0x267   : > { %v909_v1 = vsel %vm893_vm2, %v892_v0, %v841_v63 }
 0x268   : > { %1578 = vmatmul.mubr.msk.bf16.gmra.mrb[12].mxu1 %vm957_vm3, %v909_v1 }
 0x269   : > { %1592 = vmatpush3.bf16.msra.mxu1 %v1690_v7  ;;  %1597 = vmatprep.mubr.msk.bf16.mxu1 %vm1833_vm4, %v1832_v3 }
 0x26a   : > { %1593 = vmatprep.subr.bf16.mxu1 %v1832_v3 }
 0x26d   : > { %1594 = vmatpush3.bf16.msra.mxu1 %v1691_v16 }
 0x26e   : > { %1595 = vmatprep.subr.bf16.mxu1 %v1832_v3 }
 0x271   : > { %1596 = vmatpush3.bf16.msra.mxu1 %v1692_v8 }
 0x30c   : > { %v1567_v11 = vpop.f32.mrb[0].mxu1 }
 0x30d   : > { %v1017_v12 = vadd.f32 %v1567_v11, %v2237_v9  ;;  %v1008_v13 = vpop.f32.mrb[1].mxu1 }
 0x30e   : > { %v1009_v52 = vadd.f32 %v2237_v9, %v1008_v13  ;;  %v1568_v14 = vpop.f32.mrb[2].mxu1 }
 0x30f   : > { %v1073_v15 = vmax.f32 %v1017_v12, 0.0  ;;  %v1020_v17 = vadd.f32 %v1568_v14, %v2237_v9  ;;  %v1011_v18 = vpop.f32.mrb[3].mxu1 }
 0x310   : > { %v1071_v19 = vmax.f32 %v1009_v52, 0.0  ;;  %v1012_v21 = vadd.f32 %v2237_v9, %v1011_v18 }
 0x311   : > { %v1074_v22 = vmax.f32 %v1020_v17, 0.0  ;;  %v1091_v50 = vmul.f32 %v2242_v62, %v1073_v15 }
 0x312   : > { %v1072_v23 = vmax.f32 %v1012_v21, 0.0  ;;  %v1089_v25 = vmul.f32 %v2242_v62, %v1071_v19 }
 0x313   : > { %v1092_v24 = vmul.f32 %v2244_v20, %v1074_v22 }
 0x314   : > { %v1090_v27 = vmul.f32 %v2244_v20, %v1072_v23 }
 0x315   : > { %v1112_v28 = vmax.f32 %v1091_v50, %v1092_v24 }
 0x316   : > { %v1105_v29 = vmax.f32 %v1089_v25, %v1090_v27 }
 0x317   : > { %v1113_v30 = vrot.slane %v1112_v28, 4 }
 0x318   : > { %v1106_v32 = vrot.slane %v1105_v29, 4 }
 0x319   : > { %v1114_v10 = vmax.f32 %v1112_v28, %v1113_v30 }
 0x31a   : > { %v1107_v33 = vmax.f32 %v1105_v29, %v1106_v32 }
 0x31b   : > { %v1115_v34 = vrot.slane %v1114_v10, 2 }
 0x31c   : > { %v1108_v35 = vrot.slane %v1107_v33, 2  ;;  %v1571_v36 = vpop.f32.mrb[4].mxu1 }
 0x31d   : > { %v1116_v37 = vmax.f32 %v1114_v10, %v1115_v34  ;;  %v1033_v38 = vadd.f32 %v1571_v36, %v2237_v9  ;;  %v1024_v39 = vpop.f32.mrb[5].mxu1 }
 0x31e   : > { %v1109_v5 = vmax.f32 %v1107_v33, %v1108_v35  ;;  %v1025_v40 = vadd.f32 %v2237_v9, %v1024_v39  ;;  %v1572_v41 = vpop.f32.mrb[6].mxu1 }
 0x31f   : > { %v1117_v42 = vrot.slane %v1116_v37, 1  ;;  %v1077_v43 = vmax.f32 %v1033_v38, 0.0  ;;  %v1036_v44 = vadd.f32 %v1572_v41, %v2237_v9  ;;  %v1027_v46 = vpop.f32.mrb[7].mxu1 }
 0x320   : > { %v1110_v31 = vrot.slane %v1109_v5, 1  ;;  %v1075_v47 = vmax.f32 %v1025_v40, 0.0  ;;  %v1028_v48 = vadd.f32 %v2237_v9, %v1027_v46 }
 0x321   : > { %v1118_v49 = vmax.f32 %v1116_v37, %v1117_v42  ;;  %v1078_v53 = vmax.f32 %v1036_v44, 0.0  ;;  %v1095_v58 = vmul.f32 %v2242_v62, %v1077_v43 }
 0x322   : > { %v1111_v54 = vmax.f32 %v1109_v5, %v1110_v31  ;;  %v1076_v56 = vmax.f32 %v1028_v48, 0.0  ;;  %v1093_v51 = vmul.f32 %v2242_v62, %v1075_v47 }
 0x323   : > { %v1162_v57 = vpack.c.bf16 %v1118_v49, %v1118_v49  ;;  %v1096_v59 = vmul.f32 %v2244_v20, %v1078_v53 }
 0x324   : > { %v1161_v26 = vpack.c.bf16 %v1111_v54, %v1111_v54  ;;  %v1094_v60 = vmul.f32 %v2244_v20, %v1076_v56 }
 0x325   : > { %v1201_v61 = vunpack.c.l.b16 %v1162_v57  ;;  %v1126_v0 = vmax.f32 %v1095_v58, %v1096_v59 }
 0x326   : > { %v1200_v63 = vunpack.c.l.b16 %v1161_v26  ;;  %v1119_v1 = vmax.f32 %v1093_v51, %v1094_v60 }
 0x327   : > { %v1127_v2 = vrot.slane %v1126_v0, 4 }
 0x328   : > { %v1209_v3 = vsel %vm1208_vm5, %v1201_v61, %v1200_v63  ;;  %v1120_v45 = vrot.slane %v1119_v1, 4 }
 0x329   : > { %v1128_v4 = vmax.f32 %v1126_v0, %v1127_v2 }
 0x32a   : > { %v1121_v55 = vmax.f32 %v1119_v1, %v1120_v45 }
 0x32b   : > { %v1129_v6 = vrot.slane %v1128_v4, 2 }
 0x32c   : > { %v1122_v7 = vrot.slane %v1121_v55, 2 }
 0x32d   : > { %v1130_v16 = vmax.f32 %v1128_v4, %v1129_v6 }
 0x32e   : > { %v1123_v8 = vmax.f32 %v1121_v55, %v1122_v7 }
 0x32f   : > { %v1131_v11 = vrot.slane %v1130_v16, 1 }
 0x330   : > { %v1124_v12 = vrot.slane %v1123_v8, 1  ;;  %v1575_v13 = vpop.f32.mrb[8].mxu1 }
 0x331   : > { %v1132_v52 = vmax.f32 %v1130_v16, %v1131_v11  ;;  %v1049_v14 = vadd.f32 %v1575_v13, %v2237_v9  ;;  %v1040_v15 = vpop.f32.mrb[9].mxu1 }
 0x332   : > { %v1125_v17 = vmax.f32 %v1123_v8, %v1124_v12  ;;  %v1041_v18 = vadd.f32 %v2237_v9, %v1040_v15  ;;  %v1576_v19 = vpop.f32.mrb[10].mxu1 }
 0x333   : > { %v1164_v21 = vpack.c.bf16 %v1132_v52, %v1132_v52  ;;  %v1081_v22 = vmax.f32 %v1049_v14, 0.0  ;;  %v1052_v23 = vadd.f32 %v1576_v19, %v2237_v9  ;;  %v1043_v50 = vpop.f32.mrb[11].mxu1 }
 0x334   : > { %v1163_v24 = vpack.c.bf16 %v1125_v17, %v1125_v17  ;;  %v1079_v25 = vmax.f32 %v1041_v18, 0.0  ;;  %v1044_v27 = vadd.f32 %v2237_v9, %v1043_v50 }
 0x335   : > { %v1082_v28 = vmax.f32 %v1052_v23, 0.0  ;;  %v1203_v32 = vunpack.c.l.b16 %v1164_v21  ;;  %v1099_v10 = vmul.f32 %v2242_v62, %v1081_v22 }
 0x336   : > { %v1202_v29 = vunpack.c.l.b16 %v1163_v24  ;;  %v1080_v30 = vmax.f32 %v1044_v27, 0.0  ;;  %v1097_v35 = vmul.f32 %v2242_v62, %v1079_v25 }
 0x337   : > { %v1100_v33 = vmul.f32 %v2244_v20, %v1082_v28 }
 0x338   : > { %v1211_v34 = vsel %vm1210_vm6, %v1202_v29, %v1209_v3  ;;  %v1098_v36 = vmul.f32 %v2244_v20, %v1080_v30 }
 0x339   : > { %v1140_v37 = vmax.f32 %v1099_v10, %v1100_v33  ;;  %v1213_v38 = vsel %vm1212_vm7, %v1203_v32, %v1211_v34  ;;  %v1472_v32 = vld [vmem:[%s2331_s6] ss:$0 sm:$0xff] }
 0x33a   : > { %v1133_v39 = vmax.f32 %v1097_v35, %v1098_v36 }
 0x33b   : > { %v1141_v5 = vrot.slane %v1140_v37, 4  ;;  %v1579_v40 = vpop.f32.mrb[12].mxu1 }
 0x33c   : > { %v1134_v41 = vrot.slane %v1133_v39, 4  ;;  %v1065_v42 = vadd.f32 %v1579_v40, %v2237_v9  ;;  %v1056_v43 = vpop.f32.mrb[13].mxu1 }
 0x33d   : > { %v1142_v44 = vmax.f32 %v1140_v37, %v1141_v5  ;;  %v1057_v46 = vadd.f32 %v2237_v9, %v1056_v43  ;;  %v1580_v31 = vpop.f32.mrb[14].mxu1 }
 0x33e   : > { %v1135_v47 = vmax.f32 %v1133_v39, %v1134_v41  ;;  %v1085_v48 = vmax.f32 %v1065_v42, 0.0  ;;  %v1068_v49 = vadd.f32 %v1580_v31, %v2237_v9  ;;  %v1059_v53 = vpop.f32.mrb[15].mxu1 }
 0x33f   : > { %v1143_v54 = vrot.slane %v1142_v44, 2  ;;  %v1083_v56 = vmax.f32 %v1057_v46, 0.0  ;;  %v1060_v57 = vadd.f32 %v2237_v9, %v1059_v53 }
 0x340   : > { %v1136_v58 = vrot.slane %v1135_v47, 2  ;;  %v1086_v59 = vmax.f32 %v1068_v49, 0.0  ;;  %v1103_v61 = vmul.f32 %v2242_v62, %v1085_v48 }
 0x341   : > { %v1144_v26 = vmax.f32 %v1142_v44, %v1143_v54  ;;  %v1084_v51 = vmax.f32 %v1060_v57, 0.0  ;;  %v1101_v1 = vmul.f32 %v2242_v62, %v1083_v56 }
 0x342   : > { %v1137_v60 = vmax.f32 %v1135_v47, %v1136_v58  ;;  %v1104_v0 = vmul.f32 %v2244_v20, %v1086_v59 }
 0x343   : > { %v1145_v63 = vrot.slane %v1144_v26, 1  ;;  %v1102_v2 = vmul.f32 %v2244_v20, %v1084_v51 }
 0x344   : > { %v1138_v3 = vrot.slane %v1137_v60, 1  ;;  %v1154_v45 = vmax.f32 %v1103_v61, %v1104_v0 }
 0x345   : > { %v1146_v4 = vmax.f32 %v1144_v26, %v1145_v63  ;;  %v1147_v55 = vmax.f32 %v1101_v1, %v1102_v2 }
 0x346   : > { %v1139_v6 = vmax.f32 %v1137_v60, %v1138_v3  ;;  %v1155_v9 = vrot.slane %v1154_v45, 4 }
 0x347   : > { %v1166_v7 = vpack.c.bf16 %v1146_v4, %v1146_v4  ;;  %v1148_v16 = vrot.slane %v1147_v55, 4 }
 0x348   : > { %v1165_v8 = vpack.c.bf16 %v1139_v6, %v1139_v6  ;;  %v1156_v11 = vmax.f32 %v1154_v45, %v1155_v9 }
 0x349   : > { %v1149_v12 = vmax.f32 %v1147_v55, %v1148_v16  ;;  %v1205_v14 = vunpack.c.l.b16 %v1166_v7 }
 0x34a   : > { %v1204_v13 = vunpack.c.l.b16 %v1165_v8  ;;  %v1157_v52 = vrot.slane %v1156_v11, 2 }
 0x34b   : > { %v1150_v15 = vrot.slane %v1149_v12, 2 }
 0x34c   : > { %v1215_v62 = vsel %vm1214_vm8, %v1204_v13, %v1213_v38  ;;  %v1158_v17 = vmax.f32 %v1156_v11, %v1157_v52 }
 0x34d   : > { %v1151_v20 = vmax.f32 %v1149_v12, %v1150_v15  ;;  %v1217_v18 = vsel %vm1216_vm9, %v1205_v14, %v1215_v62 }
 0x34e   : > { %v1159_v19 = vrot.slane %v1158_v17, 1 }
 0x34f   : > { %v1152_v21 = vrot.slane %v1151_v20, 1 }
 0x350   : > { %v1160_v22 = vmax.f32 %v1158_v17, %v1159_v19 }
 0x351   : > { %v1153_v23 = vmax.f32 %v1151_v20, %v1152_v21 }
 0x352   : > { %v1168_v50 = vpack.c.bf16 %v1160_v22, %v1160_v22 }
 0x353   : > { %v1167_v24 = vpack.c.bf16 %v1153_v23, %v1153_v23 }
 0x354   : > { %v1207_v27 = vunpack.c.l.b16 %v1168_v50 }
 0x355   : > { %v1206_v25 = vunpack.c.l.b16 %v1167_v24 }
 0x357   : > { %v1219_v28 = vsel %vm1218_vm10, %v1206_v25, %v1217_v18 }
 0x358   : > { %v1221_v29 = vsel %vm1220_vm11, %v1207_v27, %v1219_v28 }
 0x359   : > { %v1222_v30 = vpack.c.b16 %v1221_v29, %v1221_v29 }
 0x35b   : > { %1598 = vmatmul.mubr.bf16.vlgmr.msra.gmra.mrb[16].mxu1 %v1222_v30 }
 0x42e   : > { %v1306_v10 = vpop.f32.mrb[16].mxu1 }
 0x42f   : > { %v1307_v33 = vadd.f32 %v1472_v32, %v1306_v10  ;;  %v1599_v34 = vpop.f32.mrb[17].mxu1 }
 0x430   : > { %v1309_v35 = vpop.f32.mrb[18].mxu1 }
 0x431   : > { %1312 = vst [vmem:[%s299_s20] sm:$0xff] %v1307_v33  ;;  %v1600_v36 = vpop.f32.mrb[19].mxu1 }
 0x432   : > { %1762 = shalt.err (!%p1759_p11)
}
 0x433   : > { %s1763_s14 = scalar_lea.hbm %s2283_s29, 128  ;;  %s1767_s16 = scalar_lea.hbm %s2332_s7, 256 }
 0x434   : > { %p1764_p13 = scmp.ne.s32.totalorder %s2283_s29, %s1763_s14  ;;  %p1768_p6 = scmp.lt.u32.totalorder %s2283_s29, %s2332_s7 }
 0x435   : > { %p1769_p9 = scmp.lt.u32.totalorder %s1767_s16, %s1763_s14  ;;  %p1771_p12 = scmp.lt.u32.totalorder %s1763_s14, %s2283_s29 }
 0x436   : > { %p1765_p0 = pnand %p1764_p13, %p2346_p1 }
 0x437   : > { %p1770_p10 = por %p1769_p9, %p1768_p6 }
 0x438   : > { %p1766_p5 = pneg %p1765_p0 }
 0x439   : > { %p1772_p2 = por %p1771_p12, %p1770_p10 }
 0x43b   : > { %p1773_p3 = pnand %p1772_p2, %p1766_p5 }
 0x43d   : > { %1776 = shalt.err (!%p1773_p3)
}
 0x43e   : > { %1609 = dma.vmem_to_hbm [thread:$0]  (%p2346_p1), %s2285_s21, 128, %s2283_s29, %s1314_s8  }
 0x43f PF: > { %p1626_p4 = scmp.ge.s32.totalorder %s1819_s27, 2  ;;  %s1339_s20 = sand.u32 1, %s1807_s24  }
 0x440   : > { %p2347_p7 = scmp.ne.s32.totalorder %s2338_s12, 0  ;;  %s1340_s22 = scalar_lea.sflag [#allocation4], %s1339_s20 }
 0x442   : > { %p1619_p8 = pnand %p1626_p4, %p2347_p7 }
 0x444   : > { %1802 = dma.done.wait (!%p1619_p8), %s1340_s22, 128  }
 0x445   : > { %1804 = vsyncadd (!%p1619_p8), %s1340_s22, 4294967168  ;;  %s2348_s23 = sld [smem:[#allocation11_spill]]  ;;  %p19_p11 = scmp.ge.s32.totalorder %s1900_s30, 4  }
 0x446   : > { %s2349_s24 = smov %s1811_s25  ;;  %s2350_s25 = smov %s1815_s26 }
 0x447   : > { %s2352_s27 = smov %s1900_s30  ;;  %21 = sbr.rel (!%p19_p11) target bundleno = 5 (0x5), region = 92 }
 0x44b   : > { %s2351_s26 = smov %s2348_s23 }
 0x44e   :  { %1345 = vsyncpa [#allocation3], 1 }
 0x44f   :  { %1347 = vsyncpa [#allocation3 + $0x1], 1 }
 0x450   :  { %1348 = vsyncpa [#allocation6], 1 }
 0x451   :  { %1349 = vsyncpa [#allocation4], 1 }
 0x452   :  { %1351 = vsyncpa [#allocation4 + $0x1], 1 }

</bundles_post_ra>
